<compile_context>
chip_gen: v7x
topology: tpu7x:2x2x1
jax: 0.10.0
libtpu: 0.0.40
codegen_flags: <defaults>
</compile_context>

<pallas_src>
import jax
import jax.numpy as jnp
from jax.experimental import pallas as pl
from jax.experimental.pallas import tpu as pltpu


def gp_layer_kernel(src_ref, w1_ref, b1_ref, wf_ref, b2f_ref, mask_ref,
                    key_ref, out_ref):
    """Fused GpLayer forward on one batch tile.

    src_ref  : (TB, S*D)    flattened source tile (aliased with out)
    w1_ref   : (S*D, TFP)   fuse_src weight scattered onto the flat axis, Tf padded
    b1_ref   : (1, TFP)     fuse_src bias (-1e30 on pad lanes)
    wf_ref   : (TFP, S*D)   recover weight folded with timeFeature
    b2f_ref  : (1, S*D)     recover bias scattered onto second-half columns
    mask_ref : (1, S*D)     1.0 on first-half columns of every D-chunk
    key_ref  : (TB, TFP)    output: softmax key (lane-padded)
    out_ref  : (TB, S*D)    output: concat(src first half, recovered second half)
    """
    x = src_ref[...].astype(jnp.float32)                                # (TB, S*D)

    # key = softmax(fuse_src(src[:, :, half:].flatten(1)), dim=1)
    # -> one lane-dense matmul; zero weight rows make the first-half columns inert.
    logits = jnp.dot(x, w1_ref[...],
                     preferred_element_type=jnp.float32) + b1_ref[...]  # (TB, TFP)
    m = jnp.max(logits, axis=-1, keepdims=True)
    e = jnp.exp(logits - m)                                             # pad lanes -> 0
    denom = jnp.sum(e, axis=-1, keepdims=True)
    key = e * pl.reciprocal(denom, approx=True)                         # EUP slot
    key_ref[...] = key.astype(key_ref.dtype)

    # recover(key * timeFeature) with timeFeature folded into the weight:
    # one lane-dense (TB, TFP) @ (TFP, S*D) matmul.
    rec = jnp.dot(key, wf_ref[...],
                  preferred_element_type=jnp.float32) + b2f_ref[...]    # (TB, S*D)

    # Single full-width store: keep src on the first half of every D-chunk,
    # take the recovered value on the second half.
    keep = mask_ref[...] > 0.5                                          # (1, S*D)
    out_ref[...] = jnp.where(keep, x, rec).astype(out_ref.dtype)


def _pick_batch_tile(batch, sd, tfp):
    """Largest batch tile that divides B and keeps double-buffered blocks small."""
    # ~4 MiB budget for (src + out + key) double-buffered f32 blocks — safe under
    # v5e's 16 MiB and v7x's 32 MiB scoped-VMEM defaults.
    cap = max(8, (4 << 20) // (8 * (2 * sd + tfp)))
    for tb in (512, 256, 128, 64, 32, 16, 8):
        if tb <= cap and batch % tb == 0:
            return tb
    return batch  # small / indivisible batch: single block


@jax.jit
def gp_layer(src, time_feature, w1, b1, w2, b2):
    B, S, D = src.shape
    half = D // 2
    Tf = w1.shape[1]
    SD = S * D
    TFP = max(128, pl.cdiv(Tf, 128) * 128)       # pad time-feature axis to lane width
    f32 = jnp.float32

    # ---- tiny weight folding / padding (O(SD*TFP) elems, fused by XLA) ----
    # fuse_src weight scattered to the full flat (S*D) input axis, zero on first halves.
    w1_full = jnp.zeros((S, D, Tf), f32).at[:, half:, :].set(
        w1.reshape(S, half, Tf).astype(f32))
    w1_pad = jnp.zeros((SD, TFP), f32).at[:, :Tf].set(w1_full.reshape(SD, Tf))
    b1_pad = jnp.full((1, TFP), -1e30, f32).at[:, :Tf].set(
        b1.reshape(1, Tf).astype(f32))
    # recover weight folded with timeFeature: W_fold[t, s*D+d] = tf[s,t] * w2[t, d-half]
    wf = time_feature.astype(f32).T[:, :, None] * w2.astype(f32)[:, None, :]  # (Tf,S,half)
    wf_full = jnp.zeros((Tf, S, D), f32).at[:, :, half:].set(wf)
    w_fold = jnp.zeros((TFP, SD), f32).at[:Tf, :].set(wf_full.reshape(Tf, SD))
    b2_fold = jnp.zeros((S, D), f32).at[:, half:].set(
        jnp.broadcast_to(b2.reshape(1, half).astype(f32), (S, half))).reshape(1, SD)
    # 1.0 on first-half columns of every D-chunk (keep src there).
    maskf = jnp.zeros((S, D), f32).at[:, :half].set(1.0).reshape(1, SD)

    src_flat = src.reshape(B, SD)                # free: row-major contiguous
    TB = _pick_batch_tile(B, SD, TFP)
    nb = B // TB

    in_specs = [
        pl.BlockSpec((TB, SD), lambda i: (i, 0)),     # src tile (aliased with out)
        pl.BlockSpec((SD, TFP), lambda i: (0, 0)),    # w1_pad   (resident)
        pl.BlockSpec((1, TFP), lambda i: (0, 0)),     # b1_pad
        pl.BlockSpec((TFP, SD), lambda i: (0, 0)),    # w_fold
        pl.BlockSpec((1, SD), lambda i: (0, 0)),      # b2_fold
        pl.BlockSpec((1, SD), lambda i: (0, 0)),      # keep-mask
    ]
    out_specs = (
        pl.BlockSpec((TB, TFP), lambda i: (i, 0)),    # key (lane-padded)
        pl.BlockSpec((TB, SD), lambda i: (i, 0)),     # out (flat)
    )
    out_shape = (
        jax.ShapeDtypeStruct((B, TFP), f32),
        jax.ShapeDtypeStruct((B, SD), src.dtype),
    )
    flops = 4 * B * SD * TFP                      # two lane-dense matmuls
    bytes_accessed = 4 * (2 * B * SD + B * TFP + 2 * SD * TFP + 2 * SD + TFP)

    key_pad, out_flat = pl.pallas_call(
        gp_layer_kernel,
        grid=(nb,),
        in_specs=in_specs,
        out_specs=out_specs,
        out_shape=out_shape,
        input_output_aliases={0: 1},              # reuse the src HBM buffer for out
        compiler_params=pltpu.CompilerParams(
            dimension_semantics=("parallel",)),
        cost_estimate=pl.CostEstimate(
            flops=flops, transcendentals=B * TFP, bytes_accessed=bytes_accessed),
    )(src_flat, w1_pad, b1_pad, w_fold, b2_fold, maskf)

    # Trim the lane padding / restore the (B, S, D) view (layout plumbing only).
    return key_pad[:, :Tf], out_flat.reshape(B, S, D)


if __name__ == "__main__":
    # dim_val=32 -> half=16, enc_seq_len=8, time_feature_len=24, batch=2
    B, S, D, Tf = 2, 8, 32, 24
    half = D // 2

    root = jax.random.PRNGKey(0)
    ks = jax.random.split(root, 6)
    src = jax.random.normal(ks[0], (B, S, D), jnp.float32)
    time_feature = jax.random.normal(ks[1], (S, Tf), jnp.float32)

    # PyTorch Linear default init: U(-1/sqrt(fan_in), +1/sqrt(fan_in)).
    bound1 = 1.0 / (S * half) ** 0.5
    w1 = jax.random.uniform(ks[2], (S * half, Tf), jnp.float32, -bound1, bound1)
    b1 = jax.random.uniform(ks[3], (1, Tf), jnp.float32, -bound1, bound1)
    bound2 = 1.0 / Tf ** 0.5
    w2 = jax.random.uniform(ks[4], (Tf, half), jnp.float32, -bound2, bound2)
    b2 = jax.random.uniform(ks[5], (1, half), jnp.float32, -bound2, bound2)

    key_out, out = gp_layer(src, time_feature, w1, b1, w2, b2)
    jax.block_until_ready((key_out, out))

    # Pure-JAX reference mirroring the PyTorch semantics.
    tmp_ref = src[:, :, half:].reshape(B, S * half)
    key_expected = jax.nn.softmax(tmp_ref @ w1 + b1, axis=1)
    fuse_expected = key_expected[None, :, :] * time_feature[:, None, :]   # (S, B, Tf)
    rec_expected = fuse_expected @ w2 + b2                                # (S, B, half)
    out_expected = jnp.concatenate(
        [src[:, :, :half], jnp.transpose(rec_expected, (1, 0, 2))], axis=-1)

    # Tolerance covers the approximate EUP reciprocal used for the softmax normalize.
    assert key_out.shape == (B, Tf) and out.shape == (B, S, D)
    assert jnp.allclose(key_out, key_expected, atol=2e-3, rtol=2e-3)
    assert jnp.allclose(out, out_expected, atol=2e-3, rtol=2e-3)
    print("KERNEL_OK")
</pallas_src>

<mosaic_0001>
module attributes {stable_mosaic.version = 11 : i64} {
  func.func @gp_layer_kernel(%arg0: i32, %arg1: memref<2x256xf32, #tpu.memory_space<vmem>>, %arg2: memref<256x128xf32, #tpu.memory_space<vmem>>, %arg3: memref<1x128xf32, #tpu.memory_space<vmem>>, %arg4: memref<128x256xf32, #tpu.memory_space<vmem>>, %arg5: memref<1x256xf32, #tpu.memory_space<vmem>>, %arg6: memref<1x256xf32, #tpu.memory_space<vmem>>, %arg7: memref<2x128xf32, #tpu.memory_space<vmem>>, %arg8: memref<2x256xf32, #tpu.memory_space<vmem>>) attributes {dimension_semantics = [#tpu.dimension_semantics<parallel>], iteration_bounds = array<i64: 1>, scalar_prefetch = 0 : i64, scratch_operands = 0 : i64, tpu.core_type = #tpu.core_type<tc>, window_params = [{transform_indices = @transform_0, window_bounds = array<i64: 2, 256>}, {pipeline_mode = #tpu.pipeline_mode<synchronous>, transform_indices = @transform_1, window_bounds = array<i64: 256, 128>}, {pipeline_mode = #tpu.pipeline_mode<synchronous>, transform_indices = @transform_2, window_bounds = array<i64: 1, 128>}, {pipeline_mode = #tpu.pipeline_mode<synchronous>, transform_indices = @transform_3, window_bounds = array<i64: 128, 256>}, {pipeline_mode = #tpu.pipeline_mode<synchronous>, transform_indices = @transform_4, window_bounds = array<i64: 1, 256>}, {pipeline_mode = #tpu.pipeline_mode<synchronous>, transform_indices = @transform_5, window_bounds = array<i64: 1, 256>}, {transform_indices = @transform_6, window_bounds = array<i64: 2, 128>}, {transform_indices = @transform_7, window_bounds = array<i64: 2, 256>}]} {
    %c0 = arith.constant 0 : index
    %c0_0 = arith.constant 0 : index
    %0 = vector.load %arg1[%c0, %c0_0] : memref<2x256xf32, #tpu.memory_space<vmem>>, vector<2x256xf32>
    %c0_1 = arith.constant 0 : index
    %c0_2 = arith.constant 0 : index
    %1 = vector.load %arg2[%c0_1, %c0_2] : memref<256x128xf32, #tpu.memory_space<vmem>>, vector<256x128xf32>
    %cst = arith.constant dense<0.000000e+00> : vector<2x128xf32>
    %2 = tpu.matmul %0, %1, %cst {dimension_numbers = #tpu.dot_dimension_numbers<[1], [0], [0], [1], [0, 0, 1, 1], [], []>} : vector<2x256xf32>, vector<256x128xf32>, vector<2x128xf32> -> vector<2x128xf32>
    %c0_3 = arith.constant 0 : index
    %c0_4 = arith.constant 0 : index
    %3 = vector.load %arg3[%c0_3, %c0_4] : memref<1x128xf32, #tpu.memory_space<vmem>>, vector<1x128xf32>
    %4 = vector.broadcast %3 : vector<1x128xf32> to vector<2x128xf32>
    %5 = arith.addf %2, %4 : vector<2x128xf32>
    %cst_5 = arith.constant dense<0xFF800000> : vector<2xf32>
    %6 = vector.multi_reduction <maximumf>, %5, %cst_5 [1] : vector<2x128xf32> to vector<2xf32>
    %7 = vector.shape_cast %6 : vector<2xf32> to vector<2x1xf32>
    %8 = vector.broadcast %7 : vector<2x1xf32> to vector<2x128xf32>
    %9 = arith.subf %5, %8 : vector<2x128xf32>
    %10 = math.exp %9 : vector<2x128xf32>
    %cst_6 = arith.constant dense<0.000000e+00> : vector<2xf32>
    %11 = vector.multi_reduction <add>, %10, %cst_6 [1] : vector<2x128xf32> to vector<2xf32>
    %12 = vector.shape_cast %11 : vector<2xf32> to vector<2x1xf32>
    %13 = tpu.reciprocal %12 {approx = true} : vector<2x1xf32> -> vector<2x1xf32>
    %14 = vector.broadcast %13 : vector<2x1xf32> to vector<2x128xf32>
    %15 = arith.mulf %10, %14 : vector<2x128xf32>
    %c0_7 = arith.constant 0 : index
    %c0_8 = arith.constant 0 : index
    %16 = vector.load %arg7[%c0_7, %c0_8] : memref<2x128xf32, #tpu.memory_space<vmem>>, vector<2x128xf32>
    tpu.vector_store %arg7[%c0_7, %c0_8], %15 {strides = array<i32>} : memref<2x128xf32, #tpu.memory_space<vmem>>, vector<2x128xf32>,
    %c0_9 = arith.constant 0 : index
    %c0_10 = arith.constant 0 : index
    %17 = vector.load %arg4[%c0_9, %c0_10] : memref<128x256xf32, #tpu.memory_space<vmem>>, vector<128x256xf32>
    %cst_11 = arith.constant dense<0.000000e+00> : vector<2x256xf32>
    %18 = tpu.matmul %15, %17, %cst_11 {dimension_numbers = #tpu.dot_dimension_numbers<[1], [0], [0], [1], [0, 0, 1, 1], [], []>} : vector<2x128xf32>, vector<128x256xf32>, vector<2x256xf32> -> vector<2x256xf32>
    %c0_12 = arith.constant 0 : index
    %c0_13 = arith.constant 0 : index
    %19 = vector.load %arg5[%c0_12, %c0_13] : memref<1x256xf32, #tpu.memory_space<vmem>>, vector<1x256xf32>
    %20 = vector.broadcast %19 : vector<1x256xf32> to vector<2x256xf32>
    %21 = arith.addf %18, %20 : vector<2x256xf32>
    %c0_14 = arith.constant 0 : index
    %c0_15 = arith.constant 0 : index
    %22 = vector.load %arg6[%c0_14, %c0_15] : memref<1x256xf32, #tpu.memory_space<vmem>>, vector<1x256xf32>
    %cst_16 = arith.constant 5.000000e-01 : f32
    %23 = vector.broadcast %cst_16 : f32 to vector<1x256xf32>
    %24 = arith.cmpf ogt, %22, %23 : vector<1x256xf32>
    %25 = vector.shape_cast %24 : vector<1x256xi1> to vector<1x256xi1>
    %26 = vector.broadcast %25 : vector<1x256xi1> to vector<2x256xi1>
    %27 = arith.select %26, %0, %21 : vector<2x256xi1>, vector<2x256xf32>
    %c0_17 = arith.constant 0 : index
    %c0_18 = arith.constant 0 : index
    %28 = vector.load %arg8[%c0_17, %c0_18] : memref<2x256xf32, #tpu.memory_space<vmem>>, vector<2x256xf32>
    tpu.vector_store %arg8[%c0_17, %c0_18], %27 {strides = array<i32>} : memref<2x256xf32, #tpu.memory_space<vmem>>, vector<2x256xf32>,
    return
  }
  func.func @transform_0(%arg0: i32) -> (i32, i32) {
    %c0_i32 = arith.constant 0 : i32
    %c0_i32_0 = arith.constant 0 : i32
    return %arg0, %c0_i32 : i32, i32
  }
  func.func @transform_1(%arg0: i32) -> (i32, i32) {
    %c0_i32 = arith.constant 0 : i32
    %c0_i32_0 = arith.constant 0 : i32
    %c0_i32_1 = arith.constant 0 : i32
    return %c0_i32, %c0_i32_0 : i32, i32
  }
  func.func @transform_2(%arg0: i32) -> (i32, i32) {
    %c0_i32 = arith.constant 0 : i32
    %c0_i32_0 = arith.constant 0 : i32
    %c0_i32_1 = arith.constant 0 : i32
    return %c0_i32, %c0_i32_0 : i32, i32
  }
  func.func @transform_3(%arg0: i32) -> (i32, i32) {
    %c0_i32 = arith.constant 0 : i32
    %c0_i32_0 = arith.constant 0 : i32
    %c0_i32_1 = arith.constant 0 : i32
    return %c0_i32, %c0_i32_0 : i32, i32
  }
  func.func @transform_4(%arg0: i32) -> (i32, i32) {
    %c0_i32 = arith.constant 0 : i32
    %c0_i32_0 = arith.constant 0 : i32
    %c0_i32_1 = arith.constant 0 : i32
    return %c0_i32, %c0_i32_0 : i32, i32
  }
  func.func @transform_5(%arg0: i32) -> (i32, i32) {
    %c0_i32 = arith.constant 0 : i32
    %c0_i32_0 = arith.constant 0 : i32
    %c0_i32_1 = arith.constant 0 : i32
    return %c0_i32, %c0_i32_0 : i32, i32
  }
  func.func @transform_6(%arg0: i32) -> (i32, i32) {
    %c0_i32 = arith.constant 0 : i32
    %c0_i32_0 = arith.constant 0 : i32
    return %arg0, %c0_i32 : i32, i32
  }
  func.func @transform_7(%arg0: i32) -> (i32, i32) {
    %c0_i32 = arith.constant 0 : i32
    %c0_i32_0 = arith.constant 0 : i32
    return %arg0, %c0_i32 : i32, i32
  }
}

</mosaic_0001>

<bundles_post_ra>
// kernel: gp_layer.1
= control target key start
LH: loop header
LB: loop body
LE: loop exit
PB: predicated region body
PF: predicated region fallthrough
CT: control target
= control target key end

     0   :  { %s727_s0 = inlined_call_operand.vmem [shape: f32[2,256], index: 0, kind: input, shape index: {}, may-alias: {0,7}]   ;;  %s728_s1 = inlined_call_operand.vmem [shape: f32[256,128], index: 1, kind: input, shape index: {}]   ;;  %s729_s2 = inlined_call_operand.vmem [shape: f32[1,128], index: 2, kind: input, shape index: {}]   ;;  %s730_s3 = inlined_call_operand.vmem [shape: f32[128,256], index: 3, kind: input, shape index: {}]   ;;  %s731_s4 = inlined_call_operand.vmem [shape: f32[1,256], index: 4, kind: input, shape index: {}]   ;;  %s732_s5 = inlined_call_operand.vmem [shape: f32[1,256], index: 5, kind: input, shape index: {}]   ;;  %s733_s6 = inlined_call_operand.hbm [shape: f32[2,128], index: 6, kind: output, shape index: {0}]   ;;  %s734_s7 = inlined_call_operand.vmem [shape: f32[2,256], index: 7, kind: output, shape index: {1}, may-alias: {0,7}]  }
   0x1   :  { %v43_v0 = vld [vmem:[%s728_s1 + $0x80] sm:$0xff]  ;;  %v44_v1 = vld [vmem:[%s728_s1 + $0x88] sm:$0xff]  ;;  %v45_v5 = vld [vmem:[%s728_s1 + $0x90] sm:$0xff] }
   0x2   :  { %v27_v2 = vld [vmem:[%s728_s1] sm:$0xff]  ;;  %v358_v3 = vpack.c.bf16 %v44_v1, %v43_v0  ;;  %v28_v4 = vld [vmem:[%s728_s1 + $0x8] sm:$0xff]  ;;  %v46_v6 = vld [vmem:[%s728_s1 + $0x98] sm:$0xff] }
   0x3   :  { %v360_v7 = vpack.c.bf16 %v28_v4, %v27_v2  ;;  %v362_v8 = vpack.c.bf16 %v46_v6, %v45_v5  ;;  %v29_v9 = vld [vmem:[%s728_s1 + $0x10] sm:$0xff]  ;;  %v30_v10 = vld [vmem:[%s728_s1 + $0x18] sm:$0xff]  ;;  %v47_v11 = vld [vmem:[%s728_s1 + $0xa0] sm:$0xff] }
   0x4   :  { %359 = vmatprep.subr.bf16.mxu0 %v358_v3  ;;  %v48_v12 = vld [vmem:[%s728_s1 + $0xa8] sm:$0xff]  ;;  %v364_v13 = vpack.c.bf16 %v30_v10, %v29_v9  ;;  %v31_v15 = vld [vmem:[%s728_s1 + $0x20] sm:$0xff]  ;;  %v49_v17 = vld [vmem:[%s728_s1 + $0xb0] sm:$0xff] }
   0x5   :  { %361 = vmatpush3.bf16.msra.mxu0 %v360_v7  ;;  %v366_v14 = vpack.c.bf16 %v48_v12, %v47_v11  ;;  %v32_v16 = vld [vmem:[%s728_s1 + $0x28] sm:$0xff]  ;;  %v50_v18 = vld [vmem:[%s728_s1 + $0xb8] sm:$0xff]  ;;  %v33_v21 = vld [vmem:[%s728_s1 + $0x30] sm:$0xff] }
   0x6   :  { %363 = vmatprep.subr.bf16.mxu0 %v362_v8  ;;  %v368_v19 = vpack.c.bf16 %v32_v16, %v31_v15  ;;  %v370_v20 = vpack.c.bf16 %v50_v18, %v49_v17  ;;  %v34_v22 = vld [vmem:[%s728_s1 + $0x38] sm:$0xff]  ;;  %v51_v23 = vld [vmem:[%s728_s1 + $0xc0] sm:$0xff]  ;;  %v52_v24 = vld [vmem:[%s728_s1 + $0xc8] sm:$0xff] }
   0x7   :  { %v553_v25 = vld.sshfl [vmem:[%s727_s0] sm:$0x33 pattern:$0x76325410] }
   0x8   :  { %v557_v26 = vcombine.high %v553_v25, %v553_v25 }
   0x9   :  { %365 = vmatpush3.bf16.msra.mxu0 %v364_v13 }
   0xa   :  { %367 = vmatprep.subr.bf16.mxu0 %v366_v14 }
   0xb   :  { %13 = vsyncpa [#allocation3], 0  ;;  %v372_v27 = vpack.c.bf16 %v34_v22, %v33_v21  ;;  %v374_v28 = vpack.c.bf16 %v52_v24, %v51_v23  ;;  %v35_v29 = vld [vmem:[%s728_s1 + $0x40] sm:$0xff]  ;;  %v36_v30 = vld [vmem:[%s728_s1 + $0x48] sm:$0xff]  ;;  %141 = vmatprep.mubr.f32.mxu0 %v557_v26  ;;  %vm147_vm0 = vcmask 1041408   ;;  %s454_s8 = smov [#allocation2]  }
   0xc   :  { %v53_v31 = vld [vmem:[%s728_s1 + $0xd0] sm:$0xff]  ;;  %v54_v32 = vld [vmem:[%s728_s1 + $0xd8] sm:$0xff]  ;;  %v376_v33 = vpack.c.bf16 %v36_v30, %v35_v29  ;;  %v55_v37 = vld [vmem:[%s728_s1 + $0xe0] sm:$0xff]  ;;  %s308_s9 = sshll.u32 %s454_s8, 4  ;;  %s309_s9 = int_to_ptr.vmem [resolvable:$true] %s308_s9 }
   0xd   :  { %369 = vmatpush3.bf16.msra.mxu0 %v368_v19  ;;  %v378_v34 = vpack.c.bf16 %v54_v32, %v53_v31  ;;  %v37_v35 = vld [vmem:[%s728_s1 + $0x50] sm:$0xff]  ;;  %v38_v36 = vld [vmem:[%s728_s1 + $0x58] sm:$0xff]  ;;  %v56_v38 = vld [vmem:[%s728_s1 + $0xe8] sm:$0xff]  ;;  %s429_s10 = scalar_lea.vmem %s309_s9, 32  ;;  %p434_p1 = scmp.lt.s32.totalorder %s309_s9, %s309_s9 }
   0xe   :  { %371 = vmatprep.subr.bf16.mxu0 %v370_v20  ;;  %v380_v39 = vpack.c.bf16 %v38_v36, %v37_v35  ;;  %v382_v40 = vpack.c.bf16 %v56_v38, %v55_v37  ;;  %v39_v41 = vld [vmem:[%s728_s1 + $0x60] sm:$0xff]  ;;  %v40_v42 = vld [vmem:[%s728_s1 + $0x68] sm:$0xff]  ;;  %v57_v43 = vld [vmem:[%s728_s1 + $0xf0] sm:$0xff]  ;;  %p430_p0 = scmp.ne.s32.totalorder %s309_s9, %s429_s10  ;;  %p435_p2 = scmp.lt.s32.totalorder %s429_s10, %s429_s10 }
   0xf   :  { %v58_v44 = vld [vmem:[%s728_s1 + $0xf8] sm:$0xff]  ;;  %v384_v45 = vpack.c.bf16 %v40_v42, %v39_v41  ;;  %v41_v47 = vld [vmem:[%s728_s1 + $0x70] sm:$0xff]  ;;  %v320_v52 = vld [vmem:[%s729_s2] ss:$0 sm:$0xff]  ;;  %v453_v42 = vmov 0.0  }
  0x10   :  { %v386_v46 = vpack.c.bf16 %v58_v44, %v57_v43  ;;  %v42_v48 = vld [vmem:[%s728_s1 + $0x78] sm:$0xff]  ;;  %v161_v56 = vld [vmem:[%s730_s3 + $0x8] sm:$0xff]  ;;  %v160_v58 = vld [vmem:[%s730_s3] sm:$0xff]  ;;  %268 = vmatprep.mubr.f32.mxu1 %v453_v42  ;;  %p436_p3 = por %p435_p2, %p434_p1 }
  0x11   :  { %373 = vmatpush3.bf16.msra.mxu0 %v372_v27  ;;  %v388_v49 = vpack.c.bf16 %v42_v48, %v41_v47  ;;  %v163_v57 = vld [vmem:[%s730_s3 + $0x18] sm:$0xff]  ;;  %v162_v60 = vld [vmem:[%s730_s3 + $0x10] sm:$0xff]  ;;  %v165_v61 = vld [vmem:[%s730_s3 + $0x28] sm:$0xff] }
  0x12   :  { %375 = vmatprep.subr.bf16.mxu0 %v374_v28  ;;  %v390_v59 = vpack.c.bf16 %v163_v57, %v161_v56  ;;  %v167_v62 = vld [vmem:[%s730_s3 + $0x38] sm:$0xff]  ;;  %v392_v63 = vpack.c.bf16 %v162_v60, %v160_v58  ;;  %v164_v1 = vld [vmem:[%s730_s3 + $0x20] sm:$0xff]  ;;  %v166_v2 = vld [vmem:[%s730_s3 + $0x30] sm:$0xff]  ;;  %p437_p4 = pnand %p436_p3, %p430_p0 }
  0x13   :  { %v394_v0 = vpack.c.bf16 %v167_v62, %v165_v61  ;;  %v169_v3 = vld [vmem:[%s730_s3 + $0x48] sm:$0xff]  ;;  %v171_v4 = vld [vmem:[%s730_s3 + $0x58] sm:$0xff]  ;;  %v396_v5 = vpack.c.bf16 %v166_v2, %v164_v1  ;;  %v168_v7 = vld [vmem:[%s730_s3 + $0x40] sm:$0xff] }
  0x14   :  { %391 = vmatprep.subr.bf16.mxu1 %v390_v59  ;;  %v398_v6 = vpack.c.bf16 %v171_v4, %v169_v3  ;;  %v170_v8 = vld [vmem:[%s730_s3 + $0x50] sm:$0xff]  ;;  %v173_v9 = vld [vmem:[%s730_s3 + $0x68] sm:$0xff]  ;;  %v175_v10 = vld [vmem:[%s730_s3 + $0x78] sm:$0xff] }
  0x15   :  { %377 = vmatpush3.bf16.msra.mxu0 %v376_v33  ;;  %393 = vmatpush1.bf16.msra.mxu1 %v392_v63  ;;  %v400_v11 = vpack.c.bf16 %v170_v8, %v168_v7  ;;  %v402_v12 = vpack.c.bf16 %v175_v10, %v173_v9  ;;  %v172_v13 = vld [vmem:[%s730_s3 + $0x60] sm:$0xff]  ;;  %v174_v14 = vld [vmem:[%s730_s3 + $0x70] sm:$0xff]  ;;  %v177_v15 = vld [vmem:[%s730_s3 + $0x88] sm:$0xff] }
  0x16   :  { %379 = vmatprep.subr.bf16.mxu0 %v378_v34  ;;  %395 = vmatprep.subr.bf16.mxu1 %v394_v0  ;;  %v179_v16 = vld [vmem:[%s730_s3 + $0x98] sm:$0xff]  ;;  %v404_v17 = vpack.c.bf16 %v174_v14, %v172_v13  ;;  %v176_v19 = vld [vmem:[%s730_s3 + $0x80] sm:$0xff]  ;;  %v178_v20 = vld [vmem:[%s730_s3 + $0x90] sm:$0xff] }
  0x17   :  { %v406_v18 = vpack.c.bf16 %v179_v16, %v177_v15  ;;  %v408_v21 = vpack.c.bf16 %v178_v20, %v176_v19  ;;  %v181_v29 = vld [vmem:[%s730_s3 + $0xa8] sm:$0xff]  ;;  %v183_v30 = vld [vmem:[%s730_s3 + $0xb8] sm:$0xff]  ;;  %v180_v32 = vld [vmem:[%s730_s3 + $0xa0] sm:$0xff] }
  0x18   :  { %v410_v31 = vpack.c.bf16 %v183_v30, %v181_v29  ;;  %v182_v33 = vld [vmem:[%s730_s3 + $0xb0] sm:$0xff]  ;;  %v185_v35 = vld [vmem:[%s730_s3 + $0xc8] sm:$0xff]  ;;  %v187_v36 = vld [vmem:[%s730_s3 + $0xd8] sm:$0xff] }
  0x19   :  { %381 = vmatpush3.bf16.msra.mxu0 %v380_v39  ;;  %397 = vmatpush1.bf16.msra.mxu1 %v396_v5  ;;  %v412_v34 = vpack.c.bf16 %v182_v33, %v180_v32  ;;  %v184_v37 = vld [vmem:[%s730_s3 + $0xc0] sm:$0xff]  ;;  %v414_v38 = vpack.c.bf16 %v187_v36, %v185_v35  ;;  %v186_v39 = vld [vmem:[%s730_s3 + $0xd0] sm:$0xff]  ;;  %v191_v41 = vld [vmem:[%s730_s3 + $0xf8] sm:$0xff] }
  0x1a   :  { %383 = vmatprep.subr.bf16.mxu0 %v382_v40  ;;  %399 = vmatprep.subr.bf16.mxu1 %v398_v6  ;;  %v189_v40 = vld [vmem:[%s730_s3 + $0xe8] sm:$0xff]  ;;  %v416_v43 = vpack.c.bf16 %v186_v39, %v184_v37 }
  0x1b   :  { %v418_v44 = vpack.c.bf16 %v191_v41, %v189_v40 }
  0x1d   :  { %385 = vmatpush3.bf16.msra.mxu0 %v384_v45  ;;  %401 = vmatpush1.bf16.msra.mxu1 %v400_v11  ;;  %v188_v45 = vld [vmem:[%s730_s3 + $0xe0] sm:$0xff] }
  0x1e   :  { %387 = vmatprep.subr.bf16.mxu0 %v386_v46  ;;  %403 = vmatprep.subr.bf16.mxu1 %v402_v12  ;;  %v190_v46 = vld [vmem:[%s730_s3 + $0xf0] sm:$0xff] }
  0x1f   :  { %v420_v47 = vpack.c.bf16 %v190_v46, %v188_v45 }
  0x21   :  { %389 = vmatpush3.bf16.msra.mxu0 %v388_v49  ;;  %405 = vmatpush1.bf16.msra.mxu1 %v404_v17 }
  0x22   :  { %407 = vmatprep.subr.bf16.mxu1 %v406_v18 }
  0x24   :  { %142 = vmatmul.mubr.f32.vlgmr.msra.gmra.mrb[0].mxu0 %v553_v25 }
  0x25   :  { %409 = vmatpush1.bf16.msra.mxu1 %v408_v21 }
  0x26   :  { %411 = vmatprep.subr.bf16.mxu1 %v410_v31 }
  0x29   :  { %413 = vmatpush1.bf16.msra.mxu1 %v412_v34 }
  0x2a   :  { %415 = vmatprep.subr.bf16.mxu1 %v414_v38 }
  0x2d   :  { %417 = vmatpush1.bf16.msra.mxu1 %v416_v43 }
  0x2e   :  { %419 = vmatprep.subr.bf16.mxu1 %v418_v44 }
  0x31   :  { %421 = vmatpush1.bf16.msra.mxu1 %v420_v47 }
  0xf7   :  { %v355_v50 = vpop.f32.mrb[0].mxu0 }
  0xf8   :  { %v356_v51 = vpop.f32.mrb[1].mxu0 }
  0xf9   :  { %v357_v53 = vadd.f32 %v356_v51, %v355_v50 }
  0xfb   :  { %v144_v54 = vadd.f32 %v357_v53, %v320_v52 }
  0xfd   :  { %v148_v55 = vsel %vm147_vm0, %v144_v54, -inf }
  0xfe   :  { %149 = vmax.xlane.f32.xlu0 %v148_v55 }
 0x18b   :  { %v150_v22 = vpop.xlane.xlu0 %149 }
 0x18c   :  { %v151_v23 = vsub.f32 %v144_v54, %v150_v22 }
 0x18e   :  { %v152_v24 = vmul.f32 1.442695, %v151_v23 }
 0x190   :  { %425 = vpow2.f32 %v152_v24 }
 0x19a   :  { %v426_v27 = vpop.eup %425 }
 0x19b   :  { %v154_v28 = vsel %vm147_vm0, %v426_v27, 0.0 }
 0x19c   :  { %155 = vadd.xlane.f32.xlu0 %v154_v28 }
 0x229   :  { %v156_v48 = vpop.xlane.xlu0 %155 }
 0x22a   :  { %427 = vrcp.f32 %v156_v48 }
 0x234   :  { %v428_v49 = vpop.eup %427 }
 0x235   :  { %v158_v50 = vmul.f32 %v428_v49, %v426_v27 }
 0x237   :  { %269 = vmatmul.mubr.f32.vlgmr.msra.gmra.mrb[0].mxu1 %v158_v50  ;;  %159 = vst [vmem:[#allocation2] sm:$0x3] %v158_v50 }
 0x238   :  { %440 = shalt.err (!%p437_p4)
}
 0x239   :  { %s441_s12 = scalar_lea.hbm %s733_s6, 32 }
 0x23a   :  { %p442_p5 = scmp.ne.s32.totalorder %s733_s6, %s441_s12  ;;  %p445_p6 = scmp.lt.u32.totalorder %s441_s12, %s733_s6 }
 0x23c   :  { %p447_p7 = pnand %p445_p6, %p442_p5 }
 0x23e   :  { %450 = shalt.err (!%p447_p7)
}
 0x23f   :  { %311 = dma.vmem_to_hbm [thread:$0]  %s309_s9, 32, %s733_s6, [#allocation3]   ;;  %v194_v51 = vlaneseq  ;;  %v275_v52 = vld [vmem:[%s732_s5] sm:$0x3]  ;;  %v455_v55 = vmov 0  }
 0x240   :  { %vm276_vm1 = vcmp.gt.f32.partialorder %v275_v52, 0.5  ;;  %v192_v58 = vld [vmem:[%s731_s4] sm:$0x3] }
 0x241   :  { %v195_v53 = vshrl.u32 %v194_v51, 7  ;;  %v277_v56 = vsel %vm276_vm1, 1, %v455_v55 }
 0x243   :  { %v196_v54 = vsub.s32 0, %v195_v53  ;;  %v200_v57 = vsub.s32 1, %v195_v53 }
 0x245   :  { %v281_v59 = vrot.slane %v277_v56, %v196_v54  ;;  %v197_v60 = vrot.slane %v192_v58, %v196_v54  ;;  %v285_v61 = vrot.slane %v277_v56, %v200_v57  ;;  %v201_v62 = vrot.slane %v192_v58, %v200_v57 }
 0x247   :  { %vm286_vm2 = vcmp.eq.s32.totalorder %v281_v59, 1  ;;  %vm287_vm3 = vcmp.eq.s32.totalorder %v285_v61, 1 }
 0x30a   :  { %v270_v63 = vpop.f32.mrb[0].mxu1 }
 0x30b   :  { %v271_v0 = vadd.f32 %v270_v63, %v197_v60  ;;  %v272_v1 = vpop.f32.mrb[1].mxu1 }
 0x30c   :  { %v273_v2 = vadd.f32 %v272_v1, %v201_v62 }
 0x30d   :  { %v288_v3 = vsel %vm286_vm2, %v553_v25, %v271_v0 }
 0x30e   :  { %v289_v4 = vsel %vm287_vm3, %v557_v26, %v273_v2 }
 0x30f   :  { %v292_v5 = vcombine.low %v288_v3, %v289_v4 }
 0x311   :  { %322 = vst.sshfl [vmem:[%s734_s7] sm:$0x33 pattern:$0x76325410] %v292_v5 }
 0x312   :  { %451 = dma.done.wait [#allocation3], 32  }
 0x313   :  { %452 = vsyncadd [#allocation3], 4294967264 }
 0x314   :  { %319 = vsyncpa [#allocation3], 1 }

</bundles_post_ra>
